<compile_context>
chip_gen: v6e
topology: v6e:2x2x1
jax: 0.10.0
libtpu: 0.0.40
codegen_flags: <defaults>
</compile_context>

<pallas_src>
import jax
import jax.numpy as jnp
from jax.experimental import pallas as pl
from jax.experimental.pallas import tpu as pltpu


def mlp_kernel(x_ref, w1_ref, b1_ref, w2_ref, b2_ref, w3_ref, b3_ref, o_ref):
    x = x_ref[...]  # (TB, 3)

    # fc1 + relu: (TB,3) @ (3,64) on the MXU (Mosaic pads K=3 internally).
    h = jnp.dot(x, w1_ref[...], preferred_element_type=jnp.float32) + b1_ref[...]
    h = jnp.maximum(h, 0.0)

    # fc2 + relu: (TB,64) @ (64,64) on the MXU, f32 accumulation.
    h = jnp.dot(h, w2_ref[...], preferred_element_type=jnp.float32) + b2_ref[...]
    h = jnp.maximum(h, 0.0)

    # fc3 (no activation): (TB,64) @ (64,3); stored directly as a (TB,3) block.
    out = jnp.dot(h, w3_ref[...], preferred_element_type=jnp.float32) + b3_ref[...]
    o_ref[...] = out.astype(o_ref.dtype)


def net_forward(x, params, max_tile=1024):
    """x: (B, 3) float32. Returns (B, 3) float32."""
    assert max_tile % 8 == 0, "max_tile must be a multiple of 8 (f32 sublane)"
    w1, b1, w2, b2, w3, b3 = (
        params["w1"], params["b1"], params["w2"],
        params["b2"], params["w3"], params["b3"],
    )
    B = x.shape[0]

    # Batch tile: whole-array block for small B (always a legal block shape),
    # otherwise a multiple-of-8 tile with a masked ragged last block.
    # TODO(synk): for v7x megacore with max_tile < B < 2*max_tile one could
    # split into two blocks so both TensorCores are busy.
    if B <= max_tile:
        TB = B
    else:
        TB = max_tile
    grid = (pl.cdiv(B, TB),)

    # Weights/biases stay resident in VMEM across all grid steps.
    resident = lambda arr: pl.BlockSpec(arr.shape, lambda i: (0, 0))

    return pl.pallas_call(
        mlp_kernel,
        out_shape=jax.ShapeDtypeStruct((B, 3), x.dtype),
        grid=grid,
        in_specs=[
            pl.BlockSpec((TB, 3), lambda i: (i, 0)),   # x tile (pipelined)
            resident(w1), resident(b1),
            resident(w2), resident(b2),
            resident(w3), resident(b3),
        ],
        out_specs=pl.BlockSpec((TB, 3), lambda i: (i, 0)),
        compiler_params=pltpu.CompilerParams(
            dimension_semantics=("parallel",)),        # megacore split on v7x
    )(x, w1, b1, w2, b2, w3, b3)


def init_params(key):
    """Deterministic init mirroring nn.Linear's U(-1/sqrt(fan_in), 1/sqrt(fan_in))."""
    def linear(key, fan_in, fan_out):
        kw, kb = jax.random.split(key)
        bound = 1.0 / jnp.sqrt(fan_in)
        w = jax.random.uniform(kw, (fan_in, fan_out), jnp.float32, -bound, bound)
        b = jax.random.uniform(kb, (1, fan_out), jnp.float32, -bound, bound)
        return w, b

    k1, k2, k3 = jax.random.split(key, 3)
    w1, b1 = linear(k1, 3, 64)
    w2, b2 = linear(k2, 64, 64)
    w3, b3 = linear(k3, 64, 3)
    return {"w1": w1, "b1": b1, "w2": w2, "b2": b2, "w3": w3, "b3": b3}


def reference(x, p):
    h = jnp.maximum(x @ p["w1"] + p["b1"], 0.0)
    h = jnp.maximum(h @ p["w2"] + p["b2"], 0.0)
    return h @ p["w3"] + p["b3"]


if __name__ == "__main__":
    key = jax.random.PRNGKey(0)
    kp, kx1, kx2 = jax.random.split(key, 3)
    params = init_params(kp)

    # Small batch (single whole-array block).
    B = 8
    x = jax.random.normal(kx1, (B, 3), dtype=jnp.float32)
    out = jax.block_until_ready(net_forward(x, params))
    ref = reference(x, params)
    assert out.shape == (B, 3)
    assert jnp.allclose(out, ref, atol=1e-5, rtol=1e-5)

    # Non-multiple-of-8 batch, single block (block shape == full array dims).
    B2 = 260
    x2 = jax.random.normal(kx2, (B2, 3), dtype=jnp.float32)
    out2 = jax.block_until_ready(net_forward(x2, params))
    ref2 = reference(x2, params)
    assert out2.shape == (B2, 3)
    assert jnp.allclose(out2, ref2, atol=1e-5, rtol=1e-5)

    # Same batch forced through the multi-block grid with a ragged last block.
    out3 = jax.block_until_ready(net_forward(x2, params, max_tile=128))
    assert out3.shape == (B2, 3)
    assert jnp.allclose(out3, ref2, atol=1e-5, rtol=1e-5)

    print("KERNEL_OK")
</pallas_src>

<mosaic_0001>
module attributes {stable_mosaic.version = 11 : i64} {
  func.func @mlp_kernel(%arg0: i32, %arg1: memref<8x3xf32, #tpu.memory_space<vmem>>, %arg2: memref<3x64xf32, #tpu.memory_space<vmem>>, %arg3: memref<1x64xf32, #tpu.memory_space<vmem>>, %arg4: memref<64x64xf32, #tpu.memory_space<vmem>>, %arg5: memref<1x64xf32, #tpu.memory_space<vmem>>, %arg6: memref<64x3xf32, #tpu.memory_space<vmem>>, %arg7: memref<1x3xf32, #tpu.memory_space<vmem>>, %arg8: memref<8x3xf32, #tpu.memory_space<vmem>>) attributes {dimension_semantics = [#tpu.dimension_semantics<parallel>], iteration_bounds = array<i64: 1>, scalar_prefetch = 0 : i64, scratch_operands = 0 : i64, tpu.core_type = #tpu.core_type<tc>, window_params = [{transform_indices = @transform_0, window_bounds = array<i64: 8, 3>}, {pipeline_mode = #tpu.pipeline_mode<synchronous>, transform_indices = @transform_1, window_bounds = array<i64: 3, 64>}, {pipeline_mode = #tpu.pipeline_mode<synchronous>, transform_indices = @transform_2, window_bounds = array<i64: 1, 64>}, {pipeline_mode = #tpu.pipeline_mode<synchronous>, transform_indices = @transform_3, window_bounds = array<i64: 64, 64>}, {pipeline_mode = #tpu.pipeline_mode<synchronous>, transform_indices = @transform_4, window_bounds = array<i64: 1, 64>}, {pipeline_mode = #tpu.pipeline_mode<synchronous>, transform_indices = @transform_5, window_bounds = array<i64: 64, 3>}, {pipeline_mode = #tpu.pipeline_mode<synchronous>, transform_indices = @transform_6, window_bounds = array<i64: 1, 3>}, {transform_indices = @transform_7, window_bounds = array<i64: 8, 3>}]} {
    %c0 = arith.constant 0 : index
    %c0_0 = arith.constant 0 : index
    %0 = vector.load %arg1[%c0, %c0_0] : memref<8x3xf32, #tpu.memory_space<vmem>>, vector<8x3xf32>
    %c0_1 = arith.constant 0 : index
    %c0_2 = arith.constant 0 : index
    %1 = vector.load %arg2[%c0_1, %c0_2] : memref<3x64xf32, #tpu.memory_space<vmem>>, vector<3x64xf32>
    %cst = arith.constant dense<0.000000e+00> : vector<8x64xf32>
    %2 = tpu.matmul %0, %1, %cst {dimension_numbers = #tpu.dot_dimension_numbers<[1], [0], [0], [1], [0, 0, 1, 1], [], []>} : vector<8x3xf32>, vector<3x64xf32>, vector<8x64xf32> -> vector<8x64xf32>
    %c0_3 = arith.constant 0 : index
    %c0_4 = arith.constant 0 : index
    %3 = vector.load %arg3[%c0_3, %c0_4] : memref<1x64xf32, #tpu.memory_space<vmem>>, vector<1x64xf32>
    %4 = vector.broadcast %3 : vector<1x64xf32> to vector<8x64xf32>
    %5 = arith.addf %2, %4 : vector<8x64xf32>
    %cst_5 = arith.constant 0.000000e+00 : f32
    %6 = vector.broadcast %cst_5 : f32 to vector<8x64xf32>
    %7 = arith.maximumf %5, %6 : vector<8x64xf32>
    %c0_6 = arith.constant 0 : index
    %c0_7 = arith.constant 0 : index
    %8 = vector.load %arg4[%c0_6, %c0_7] : memref<64x64xf32, #tpu.memory_space<vmem>>, vector<64x64xf32>
    %cst_8 = arith.constant dense<0.000000e+00> : vector<8x64xf32>
    %9 = tpu.matmul %7, %8, %cst_8 {dimension_numbers = #tpu.dot_dimension_numbers<[1], [0], [0], [1], [0, 0, 1, 1], [], []>} : vector<8x64xf32>, vector<64x64xf32>, vector<8x64xf32> -> vector<8x64xf32>
    %c0_9 = arith.constant 0 : index
    %c0_10 = arith.constant 0 : index
    %10 = vector.load %arg5[%c0_9, %c0_10] : memref<1x64xf32, #tpu.memory_space<vmem>>, vector<1x64xf32>
    %11 = vector.broadcast %10 : vector<1x64xf32> to vector<8x64xf32>
    %12 = arith.addf %9, %11 : vector<8x64xf32>
    %cst_11 = arith.constant 0.000000e+00 : f32
    %13 = vector.broadcast %cst_11 : f32 to vector<8x64xf32>
    %14 = arith.maximumf %12, %13 : vector<8x64xf32>
    %c0_12 = arith.constant 0 : index
    %c0_13 = arith.constant 0 : index
    %15 = vector.load %arg6[%c0_12, %c0_13] : memref<64x3xf32, #tpu.memory_space<vmem>>, vector<64x3xf32>
    %cst_14 = arith.constant dense<0.000000e+00> : vector<8x3xf32>
    %16 = tpu.matmul %14, %15, %cst_14 {dimension_numbers = #tpu.dot_dimension_numbers<[1], [0], [0], [1], [0, 0, 1, 1], [], []>} : vector<8x64xf32>, vector<64x3xf32>, vector<8x3xf32> -> vector<8x3xf32>
    %c0_15 = arith.constant 0 : index
    %c0_16 = arith.constant 0 : index
    %17 = vector.load %arg7[%c0_15, %c0_16] : memref<1x3xf32, #tpu.memory_space<vmem>>, vector<1x3xf32>
    %18 = vector.broadcast %17 : vector<1x3xf32> to vector<8x3xf32>
    %19 = arith.addf %16, %18 : vector<8x3xf32>
    %c0_17 = arith.constant 0 : index
    %c0_18 = arith.constant 0 : index
    %20 = vector.load %arg8[%c0_17, %c0_18] : memref<8x3xf32, #tpu.memory_space<vmem>>, vector<8x3xf32>
    tpu.vector_store %arg8[%c0_17, %c0_18], %19 {strides = array<i32>} : memref<8x3xf32, #tpu.memory_space<vmem>>, vector<8x3xf32>,
    return
  }
  func.func @transform_0(%arg0: i32) -> (i32, i32) {
    %c0_i32 = arith.constant 0 : i32
    %c0_i32_0 = arith.constant 0 : i32
    return %arg0, %c0_i32 : i32, i32
  }
  func.func @transform_1(%arg0: i32) -> (i32, i32) {
    %c0_i32 = arith.constant 0 : i32
    %c0_i32_0 = arith.constant 0 : i32
    %c0_i32_1 = arith.constant 0 : i32
    return %c0_i32, %c0_i32_0 : i32, i32
  }
  func.func @transform_2(%arg0: i32) -> (i32, i32) {
    %c0_i32 = arith.constant 0 : i32
    %c0_i32_0 = arith.constant 0 : i32
    %c0_i32_1 = arith.constant 0 : i32
    return %c0_i32, %c0_i32_0 : i32, i32
  }
  func.func @transform_3(%arg0: i32) -> (i32, i32) {
    %c0_i32 = arith.constant 0 : i32
    %c0_i32_0 = arith.constant 0 : i32
    %c0_i32_1 = arith.constant 0 : i32
    return %c0_i32, %c0_i32_0 : i32, i32
  }
  func.func @transform_4(%arg0: i32) -> (i32, i32) {
    %c0_i32 = arith.constant 0 : i32
    %c0_i32_0 = arith.constant 0 : i32
    %c0_i32_1 = arith.constant 0 : i32
    return %c0_i32, %c0_i32_0 : i32, i32
  }
  func.func @transform_5(%arg0: i32) -> (i32, i32) {
    %c0_i32 = arith.constant 0 : i32
    %c0_i32_0 = arith.constant 0 : i32
    %c0_i32_1 = arith.constant 0 : i32
    return %c0_i32, %c0_i32_0 : i32, i32
  }
  func.func @transform_6(%arg0: i32) -> (i32, i32) {
    %c0_i32 = arith.constant 0 : i32
    %c0_i32_0 = arith.constant 0 : i32
    %c0_i32_1 = arith.constant 0 : i32
    return %c0_i32, %c0_i32_0 : i32, i32
  }
  func.func @transform_7(%arg0: i32) -> (i32, i32) {
    %c0_i32 = arith.constant 0 : i32
    %c0_i32_0 = arith.constant 0 : i32
    return %arg0, %c0_i32 : i32, i32
  }
}

</mosaic_0001>

<bundles_post_ra>
// kernel: tpu_custom_call.1
= control target key start
LH: loop header
LB: loop body
LE: loop exit
PB: predicated region body
PF: predicated region fallthrough
CT: control target
= control target key end

     0   :  { %vm39_vm0 = vcmask 1042432   ;;  %vm35_vm1 = vcmask 23552   ;;  %v369_v0 = vmov 0.0   ;;  %vm370_vm2 = vmmov 0   ;;  %s504_s1 = inlined_call_operand.vmem [shape: f32[3,64], index: 1, kind: input, shape index: {}]   ;;  %s505_s0 = inlined_call_operand.vmem [shape: f32[8,3], index: 0, kind: input, shape index: {}]   ;;  %s506_s3 = inlined_call_operand.vmem [shape: f32[64,64], index: 3, kind: input, shape index: {}]   ;;  %s507_s5 = inlined_call_operand.vmem [shape: f32[64,3], index: 5, kind: input, shape index: {}]   ;;  %s508_s2 = inlined_call_operand.vmem [shape: f32[1,64], index: 2, kind: input, shape index: {}]   ;;  %s509_s4 = inlined_call_operand.vmem [shape: f32[1,64], index: 4, kind: input, shape index: {}]   ;;  %s510_s6 = inlined_call_operand.vmem [shape: f32[1,3], index: 6, kind: input, shape index: {}]   ;;  %s511_s7 = inlined_call_operand.vmem [shape: f32[8,3], index: 7, kind: output, shape index: {}]  }
   0x1   :  { %324 = vmatprep.subr.mxu0 %v369_v0  ;;  %v27_v1 = vld [vmem:[%s504_s1] sm:$0x7]  ;;  %326 = vmatprep.mubr.msk.f32.mxu0 %vm370_vm2, %v369_v0  ;;  %v121_v3 = vld [vmem:[%s506_s3 + $0x38] sm:$0xff]  ;;  %v120_v4 = vld [vmem:[%s506_s3 + $0x30] sm:$0xff]  ;;  %vm129_vm3 = vcmask 523264  }
   0x2   :  { %v26_v2 = vld [vmem:[%s505_s0] sm:$0xff]  ;;  %325 = vmatpush3.msk.msra.mxu0 %vm39_vm0, %v27_v1  ;;  %329 = vmatprep.subr.mxu1 %v369_v0  ;;  %v119_v5 = vld [vmem:[%s506_s3 + $0x28] sm:$0xff]  ;;  %v117_v7 = vld [vmem:[%s506_s3 + $0x18] sm:$0xff] }
   0x3   :  { %327 = vmatmul.mubr.msk.f32.vlgmr.msra.gmra.mxu0 %vm35_vm1, %v26_v2  ;;  %330 = vmatpush3.msra.mxu1 %v121_v3  ;;  %v118_v6 = vld [vmem:[%s506_s3 + $0x20] sm:$0xff]  ;;  %v116_v8 = vld [vmem:[%s506_s3 + $0x10] sm:$0xff]  ;;  %v115_v9 = vld [vmem:[%s506_s3 + $0x8] sm:$0xff] }
   0x4   :  { %331 = vmatprep.subr.mxu1 %v369_v0  ;;  %345 = vmatprep.mubr.msk.f32.mxu1 %vm370_vm2, %v369_v0  ;;  %v114_v10 = vld [vmem:[%s506_s3] sm:$0xff]  ;;  %v211_v11 = vld [vmem:[%s507_s5 + $0x38] sm:$0xff]  ;;  %v210_v12 = vld [vmem:[%s507_s5 + $0x30] sm:$0xff] }
   0x5   :  { %332 = vmatpush3.msra.mxu1 %v120_v4  ;;  %348 = vmatprep.subr.mxu0 %v369_v0  ;;  %v209_v13 = vld [vmem:[%s507_s5 + $0x28] sm:$0xff]  ;;  %v208_v14 = vld [vmem:[%s507_s5 + $0x20] sm:$0xff]  ;;  %v207_v15 = vld [vmem:[%s507_s5 + $0x18] sm:$0xff] }
   0x6   :  { %333 = vmatprep.subr.mxu1 %v369_v0  ;;  %364 = vmatprep.mubr.msk.f32.mxu0 %vm370_vm2, %v369_v0  ;;  %v297_v16 = vld [vmem:[%s508_s2] ss:$0 sm:$0xff]  ;;  %v206_v21 = vld [vmem:[%s507_s5 + $0x10] sm:$0xff]  ;;  %v205_v22 = vld [vmem:[%s507_s5 + $0x8] sm:$0xff] }
   0x7   :  { %334 = vmatpush3.msra.mxu1 %v119_v5  ;;  %349 = vmatpush3.msra.mxu0 %v211_v11  ;;  %v204_v23 = vld [vmem:[%s507_s5] sm:$0xff] }
   0x8   :  { %335 = vmatprep.subr.mxu1 %v369_v0  ;;  %350 = vmatprep.subr.mxu0 %v369_v0  ;;  %v300_v24 = vld [vmem:[%s509_s4] ss:$0 sm:$0xff] }
   0x9   :  { %336 = vmatpush3.msra.mxu1 %v118_v6  ;;  %351 = vmatpush3.msra.mxu0 %v210_v12  ;;  %v302_v29 = vld [vmem:[%s510_s6] ss:$0 sm:$0xff] }
   0xa   :  { %337 = vmatprep.subr.mxu1 %v369_v0  ;;  %352 = vmatprep.subr.mxu0 %v369_v0 }
   0xb   :  { %338 = vmatpush3.msra.mxu1 %v117_v7  ;;  %353 = vmatpush3.msra.mxu0 %v209_v13 }
   0xc   :  { %339 = vmatprep.subr.mxu1 %v369_v0  ;;  %354 = vmatprep.subr.mxu0 %v369_v0 }
   0xd   :  { %340 = vmatpush3.msra.mxu1 %v116_v8  ;;  %355 = vmatpush3.msra.mxu0 %v208_v14 }
   0xe   :  { %341 = vmatprep.subr.mxu1 %v369_v0  ;;  %356 = vmatprep.subr.mxu0 %v369_v0 }
   0xf   :  { %342 = vmatpush3.msra.mxu1 %v115_v9  ;;  %357 = vmatpush3.msra.mxu0 %v207_v15 }
  0x10   :  { %343 = vmatprep.subr.mxu1 %v369_v0  ;;  %358 = vmatprep.subr.mxu0 %v369_v0 }
  0x11   :  { %344 = vmatpush3.msra.mxu1 %v114_v10  ;;  %359 = vmatpush3.msra.mxu0 %v206_v21 }
  0x12   :  { %360 = vmatprep.subr.mxu0 %v369_v0 }
  0x13   :  { %361 = vmatpush3.msra.mxu0 %v205_v22 }
  0x14   :  { %362 = vmatprep.subr.mxu0 %v369_v0 }
  0x15   :  { %363 = vmatpush3.msra.mxu0 %v204_v23 }
  0xc3   :  { %v109_v17 = vpop.f32.mrf.mxu0 }
  0xc4   :  { %v110_v18 = vadd.f32 %v297_v16, %v109_v17 }
  0xc5   :  { %v328_v19 = vpop.f32.mrf.mxu0 }
  0xc6   :  { %v113_v20 = vmax.f32 %v110_v18, 0.0 }
  0xc8   :  { %346 = vmatmul.mubr.msk.f32.vlgmr.msra.gmra.mxu1 %vm129_vm3, %v113_v20 }
 0x188   :  { %v199_v25 = vpop.f32.mrf.mxu1 }
 0x189   :  { %v200_v26 = vadd.f32 %v300_v24, %v199_v25 }
 0x18a   :  { %v347_v27 = vpop.f32.mrf.mxu1 }
 0x18b   :  { %v203_v28 = vmax.f32 %v200_v26, 0.0 }
 0x18d   :  { %365 = vmatmul.mubr.msk.f32.vlgmr.msra.gmra.mxu0 %vm129_vm3, %v203_v28 }
 0x24d   :  { %v288_v30 = vpop.f32.mrf.mxu0 }
 0x24e   :  { %v289_v31 = vadd.f32 %v302_v29, %v288_v30 }
 0x24f   :  { %v366_v32 = vpop.f32.mrf.mxu0 }
 0x250   :  { %292 = vst.msk [vmem:[%s511_s7] sm:$0xff] %vm35_vm1, %v289_v31 }

</bundles_post_ra>
